<compile_context>
chip_gen: v7x
topology: tpu7x:2x2x1
jax: 0.10.0
libtpu: 0.0.40
codegen_flags: <defaults>
</compile_context>

<pallas_src>
import functools

import jax
import jax.numpy as jnp
from jax.experimental import pallas as pl
from jax.experimental.pallas import tpu as pltpu


def _flow_kernel(z_ref, w1_ref, b1_ref, w2_ref, b2_ref, y_ref, ld_ref,
                 *, num_layers, half):
    z = z_ref[...]                                   # (TB, dim) f32
    za = z[:, :half]                                 # first half of features
    zb = z[:, half:]                                 # second half of features
    ld = jnp.zeros((z.shape[0], 1), jnp.float32)

    # Unrolled static layer loop: L is small; everything stays in registers and
    # the LLO scheduler can interleave the tiny per-layer dots.
    for l in range(num_layers):
        flip = (l % 2 == 1)
        x1 = zb if flip else za
        x2 = za if flip else zb

        # Fused first Linear of scale & shift nets: x1 @ [w1s | w1t] + [b1s | b1t]
        h = jnp.dot(x1, w1_ref[l], preferred_element_type=jnp.float32) + b1_ref[l]
        h = jnp.maximum(h, 0.0)                      # (TB, 2*dim), ReLU

        # Fused second Linear via block-diagonal weight -> [s_pre | t]
        o = jnp.dot(h, w2_ref[l], preferred_element_type=jnp.float32) + b2_ref[l]
        s = jnp.tanh(o[:, :half])                    # scale net ends in Tanh
        t = o[:, half:]                              # shift net is linear

        y2 = x2 * jnp.exp(s) + t
        ld = ld + jnp.sum(s, axis=1, keepdims=True)  # log-det accumulates in-kernel

        if flip:
            za = y2                                  # y = cat([y2, x1])
        else:
            zb = y2                                  # y = cat([x1, y2])

    y_ref[...] = jnp.concatenate([za, zb], axis=1)   # single lane-dense store
    ld_ref[...] = ld


def normalizing_flow_forward(z, packed_params):
    """NormalizingFlow.forward (all coupling layers) in one pallas_call.

    packed_params = (w1_all (L, half, 2*dim), b1_all (L, 1, 2*dim),
                     w2_all (L, 2*dim, dim),  b2_all (L, 1, dim))
    Returns (y (B, dim), log_det_total (B,)).
    """
    w1, b1, w2, b2 = packed_params
    B, dim = z.shape
    half = dim // 2
    num_layers = w1.shape[0]

    TB = B if B <= 512 else 512                      # batch tile (fits VMEM easily)
    grid = (pl.cdiv(B, TB),)

    kernel = functools.partial(_flow_kernel, num_layers=num_layers, half=half)

    def w_spec(shape):
        # Full (un-tiled) weight block, same block every grid step.
        return pl.BlockSpec(shape, lambda i: (0,) * len(shape))

    y, ld = pl.pallas_call(
        kernel,
        out_shape=(
            jax.ShapeDtypeStruct((B, dim), jnp.float32),
            jax.ShapeDtypeStruct((B, 1), jnp.float32),
        ),
        grid=grid,
        in_specs=[
            pl.BlockSpec((TB, dim), lambda i: (i, 0)),
            w_spec(w1.shape),
            w_spec(b1.shape),
            w_spec(w2.shape),
            w_spec(b2.shape),
        ],
        out_specs=(
            pl.BlockSpec((TB, dim), lambda i: (i, 0)),
            pl.BlockSpec((TB, 1), lambda i: (i, 0)),
        ),
        compiler_params=pltpu.CompilerParams(dimension_semantics=("parallel",)),
    )(z, w1, b1, w2, b2)
    return y, ld[:, 0]


def init_coupling_params(key, dim):
    """Per-layer params in the PyTorch layout (weights stored as (fan_in, fan_out))."""
    half = dim // 2
    ks = jax.random.split(key, 8)
    scale = 0.1

    def lin(kw, kb, fan_in, fan_out):
        w = scale * jax.random.normal(kw, (fan_in, fan_out), jnp.float32)
        b = scale * jax.random.normal(kb, (1, fan_out), jnp.float32)
        return w, b

    w1s, b1s = lin(ks[0], ks[1], half, dim)
    w2s, b2s = lin(ks[2], ks[3], dim, half)
    w1t, b1t = lin(ks[4], ks[5], half, dim)
    w2t, b2t = lin(ks[6], ks[7], dim, half)
    return (w1s, b1s, w2s, b2s, w1t, b1t, w2t, b2t)


def pack_flow_params(all_params, dim):
    """Stack per-layer params and fuse the scale/shift nets for the kernel."""
    half = dim // 2
    w1_l, b1_l, w2_l, b2_l = [], [], [], []
    for (w1s, b1s, w2s, b2s, w1t, b1t, w2t, b2t) in all_params:
        w1_l.append(jnp.concatenate([w1s, w1t], axis=1))      # (half, 2*dim)
        b1_l.append(jnp.concatenate([b1s, b1t], axis=1))      # (1, 2*dim)
        w2 = jnp.zeros((2 * dim, dim), jnp.float32)           # block-diagonal
        w2 = w2.at[:dim, :half].set(w2s)
        w2 = w2.at[dim:, half:].set(w2t)
        w2_l.append(w2)                                       # (2*dim, dim)
        b2_l.append(jnp.concatenate([b2s, b2t], axis=1))      # (1, dim)
    return (jnp.stack(w1_l), jnp.stack(b1_l),
            jnp.stack(w2_l), jnp.stack(b2_l))


def _reference_forward(z, all_params):
    # Pure-JAX reference (mirrors the PyTorch module) for sanity checking.
    B, dim = z.shape
    half = dim // 2
    log_det_total = jnp.zeros((B,), jnp.float32)
    for i, (w1s, b1s, w2s, b2s, w1t, b1t, w2t, b2t) in enumerate(all_params):
        flip = (i % 2 == 1)
        if flip:
            x2, x1 = z[:, :half], z[:, half:]
        else:
            x1, x2 = z[:, :half], z[:, half:]
        s = jnp.tanh(jnp.maximum(x1 @ w1s + b1s, 0.0) @ w2s + b2s)
        t = jnp.maximum(x1 @ w1t + b1t, 0.0) @ w2t + b2t
        y2 = x2 * jnp.exp(s) + t
        z = jnp.concatenate([y2, x1] if flip else [x1, y2], axis=1)
        log_det_total = log_det_total + jnp.sum(s, axis=1)
    return z, log_det_total


# TODO(synk): CouplingLayer.inverse / NormalizingFlow.inverse are not part of the
# forward pass and are not implemented here.

if __name__ == "__main__":
    B = 8
    DIM = 32
    NUM_LAYERS = 4

    root = jax.random.PRNGKey(0)
    k_in, *k_layers = jax.random.split(root, 1 + NUM_LAYERS)

    z = jax.random.normal(k_in, (B, DIM), jnp.float32)
    all_params = [init_coupling_params(k, DIM) for k in k_layers]
    packed = pack_flow_params(all_params, DIM)

    y, log_det = normalizing_flow_forward(z, packed)
    y = jax.block_until_ready(y)
    log_det = jax.block_until_ready(log_det)

    y_ref, ld_ref = _reference_forward(z, all_params)
    assert jnp.allclose(y, y_ref, atol=1e-4, rtol=1e-4)
    assert jnp.allclose(log_det, ld_ref, atol=1e-4, rtol=1e-4)

    print("KERNEL_OK")
</pallas_src>

<mosaic_0001>
module attributes {stable_mosaic.version = 11 : i64} {
  func.func @_flow_kernel(%arg0: i32, %arg1: memref<8x32xf32, #tpu.memory_space<vmem>>, %arg2: memref<4x16x64xf32, #tpu.memory_space<vmem>>, %arg3: memref<4x1x64xf32, #tpu.memory_space<vmem>>, %arg4: memref<4x64x32xf32, #tpu.memory_space<vmem>>, %arg5: memref<4x1x32xf32, #tpu.memory_space<vmem>>, %arg6: memref<8x32xf32, #tpu.memory_space<vmem>>, %arg7: memref<8x1xf32, #tpu.memory_space<vmem>>) attributes {dimension_semantics = [#tpu.dimension_semantics<parallel>], iteration_bounds = array<i64: 1>, scalar_prefetch = 0 : i64, scratch_operands = 0 : i64, tpu.core_type = #tpu.core_type<tc>, window_params = [{transform_indices = @transform_0, window_bounds = array<i64: 8, 32>}, {pipeline_mode = #tpu.pipeline_mode<synchronous>, transform_indices = @transform_1, window_bounds = array<i64: 4, 16, 64>}, {pipeline_mode = #tpu.pipeline_mode<synchronous>, transform_indices = @transform_2, window_bounds = array<i64: 4, 1, 64>}, {pipeline_mode = #tpu.pipeline_mode<synchronous>, transform_indices = @transform_3, window_bounds = array<i64: 4, 64, 32>}, {pipeline_mode = #tpu.pipeline_mode<synchronous>, transform_indices = @transform_4, window_bounds = array<i64: 4, 1, 32>}, {transform_indices = @transform_5, window_bounds = array<i64: 8, 32>}, {transform_indices = @transform_6, window_bounds = array<i64: 8, 1>}]} {
    %c0 = arith.constant 0 : index
    %c0_0 = arith.constant 0 : index
    %0 = vector.load %arg1[%c0, %c0_0] : memref<8x32xf32, #tpu.memory_space<vmem>>, vector<8x32xf32>
    %1 = vector.extract_strided_slice %0 {offsets = [0, 0], sizes = [8, 16], strides = [1, 1]} : vector<8x32xf32> to vector<8x16xf32>
    %2 = vector.extract_strided_slice %0 {offsets = [0, 16], sizes = [8, 16], strides = [1, 1]} : vector<8x32xf32> to vector<8x16xf32>
    %cst = arith.constant 0.000000e+00 : f32
    %3 = vector.broadcast %cst : f32 to vector<8x1xf32>
    %c0_1 = arith.constant 0 : index
    %c0_2 = arith.constant 0 : index
    %c0_3 = arith.constant 0 : index
    %4 = vector.load %arg2[%c0_1, %c0_2, %c0_3] : memref<4x16x64xf32, #tpu.memory_space<vmem>>, vector<1x16x64xf32>
    %5 = vector.shape_cast %4 : vector<1x16x64xf32> to vector<16x64xf32>
    %cst_4 = arith.constant dense<0.000000e+00> : vector<8x64xf32>
    %6 = tpu.matmul %1, %5, %cst_4 {dimension_numbers = #tpu.dot_dimension_numbers<[1], [0], [0], [1], [0, 0, 1, 1], [], []>} : vector<8x16xf32>, vector<16x64xf32>, vector<8x64xf32> -> vector<8x64xf32>
    %c0_5 = arith.constant 0 : index
    %c0_6 = arith.constant 0 : index
    %c0_7 = arith.constant 0 : index
    %7 = vector.load %arg3[%c0_5, %c0_6, %c0_7] : memref<4x1x64xf32, #tpu.memory_space<vmem>>, vector<1x1x64xf32>
    %8 = vector.shape_cast %7 : vector<1x1x64xf32> to vector<1x64xf32>
    %9 = vector.broadcast %8 : vector<1x64xf32> to vector<8x64xf32>
    %10 = arith.addf %6, %9 : vector<8x64xf32>
    %cst_8 = arith.constant 0.000000e+00 : f32
    %11 = vector.broadcast %cst_8 : f32 to vector<8x64xf32>
    %12 = arith.maximumf %10, %11 : vector<8x64xf32>
    %c0_9 = arith.constant 0 : index
    %c0_10 = arith.constant 0 : index
    %c0_11 = arith.constant 0 : index
    %13 = vector.load %arg4[%c0_9, %c0_10, %c0_11] : memref<4x64x32xf32, #tpu.memory_space<vmem>>, vector<1x64x32xf32>
    %14 = vector.shape_cast %13 : vector<1x64x32xf32> to vector<64x32xf32>
    %cst_12 = arith.constant dense<0.000000e+00> : vector<8x32xf32>
    %15 = tpu.matmul %12, %14, %cst_12 {dimension_numbers = #tpu.dot_dimension_numbers<[1], [0], [0], [1], [0, 0, 1, 1], [], []>} : vector<8x64xf32>, vector<64x32xf32>, vector<8x32xf32> -> vector<8x32xf32>
    %c0_13 = arith.constant 0 : index
    %c0_14 = arith.constant 0 : index
    %c0_15 = arith.constant 0 : index
    %16 = vector.load %arg5[%c0_13, %c0_14, %c0_15] : memref<4x1x32xf32, #tpu.memory_space<vmem>>, vector<1x1x32xf32>
    %17 = vector.shape_cast %16 : vector<1x1x32xf32> to vector<1x32xf32>
    %18 = vector.broadcast %17 : vector<1x32xf32> to vector<8x32xf32>
    %19 = arith.addf %15, %18 : vector<8x32xf32>
    %20 = vector.extract_strided_slice %19 {offsets = [0, 0], sizes = [8, 16], strides = [1, 1]} : vector<8x32xf32> to vector<8x16xf32>
    %21 = math.tanh %20 : vector<8x16xf32>
    %22 = vector.extract_strided_slice %19 {offsets = [0, 16], sizes = [8, 16], strides = [1, 1]} : vector<8x32xf32> to vector<8x16xf32>
    %23 = math.exp %21 : vector<8x16xf32>
    %24 = arith.mulf %2, %23 : vector<8x16xf32>
    %25 = arith.addf %24, %22 : vector<8x16xf32>
    %cst_16 = arith.constant dense<0.000000e+00> : vector<8xf32>
    %26 = vector.multi_reduction <add>, %21, %cst_16 [1] : vector<8x16xf32> to vector<8xf32>
    %27 = vector.shape_cast %26 : vector<8xf32> to vector<8x1xf32>
    %28 = arith.addf %3, %27 : vector<8x1xf32>
    %c1 = arith.constant 1 : index
    %c0_17 = arith.constant 0 : index
    %c0_18 = arith.constant 0 : index
    %29 = vector.load %arg2[%c1, %c0_17, %c0_18] : memref<4x16x64xf32, #tpu.memory_space<vmem>>, vector<1x16x64xf32>
    %30 = vector.shape_cast %29 : vector<1x16x64xf32> to vector<16x64xf32>
    %cst_19 = arith.constant dense<0.000000e+00> : vector<8x64xf32>
    %31 = tpu.matmul %25, %30, %cst_19 {dimension_numbers = #tpu.dot_dimension_numbers<[1], [0], [0], [1], [0, 0, 1, 1], [], []>} : vector<8x16xf32>, vector<16x64xf32>, vector<8x64xf32> -> vector<8x64xf32>
    %c1_20 = arith.constant 1 : index
    %c0_21 = arith.constant 0 : index
    %c0_22 = arith.constant 0 : index
    %32 = vector.load %arg3[%c1_20, %c0_21, %c0_22] : memref<4x1x64xf32, #tpu.memory_space<vmem>>, vector<1x1x64xf32>
    %33 = vector.shape_cast %32 : vector<1x1x64xf32> to vector<1x64xf32>
    %34 = vector.broadcast %33 : vector<1x64xf32> to vector<8x64xf32>
    %35 = arith.addf %31, %34 : vector<8x64xf32>
    %cst_23 = arith.constant 0.000000e+00 : f32
    %36 = vector.broadcast %cst_23 : f32 to vector<8x64xf32>
    %37 = arith.maximumf %35, %36 : vector<8x64xf32>
    %c1_24 = arith.constant 1 : index
    %c0_25 = arith.constant 0 : index
    %c0_26 = arith.constant 0 : index
    %38 = vector.load %arg4[%c1_24, %c0_25, %c0_26] : memref<4x64x32xf32, #tpu.memory_space<vmem>>, vector<1x64x32xf32>
    %39 = vector.shape_cast %38 : vector<1x64x32xf32> to vector<64x32xf32>
    %cst_27 = arith.constant dense<0.000000e+00> : vector<8x32xf32>
    %40 = tpu.matmul %37, %39, %cst_27 {dimension_numbers = #tpu.dot_dimension_numbers<[1], [0], [0], [1], [0, 0, 1, 1], [], []>} : vector<8x64xf32>, vector<64x32xf32>, vector<8x32xf32> -> vector<8x32xf32>
    %c1_28 = arith.constant 1 : index
    %c0_29 = arith.constant 0 : index
    %c0_30 = arith.constant 0 : index
    %41 = vector.load %arg5[%c1_28, %c0_29, %c0_30] : memref<4x1x32xf32, #tpu.memory_space<vmem>>, vector<1x1x32xf32>
    %42 = vector.shape_cast %41 : vector<1x1x32xf32> to vector<1x32xf32>
    %43 = vector.broadcast %42 : vector<1x32xf32> to vector<8x32xf32>
    %44 = arith.addf %40, %43 : vector<8x32xf32>
    %45 = vector.extract_strided_slice %44 {offsets = [0, 0], sizes = [8, 16], strides = [1, 1]} : vector<8x32xf32> to vector<8x16xf32>
    %46 = math.tanh %45 : vector<8x16xf32>
    %47 = vector.extract_strided_slice %44 {offsets = [0, 16], sizes = [8, 16], strides = [1, 1]} : vector<8x32xf32> to vector<8x16xf32>
    %48 = math.exp %46 : vector<8x16xf32>
    %49 = arith.mulf %1, %48 : vector<8x16xf32>
    %50 = arith.addf %49, %47 : vector<8x16xf32>
    %cst_31 = arith.constant dense<0.000000e+00> : vector<8xf32>
    %51 = vector.multi_reduction <add>, %46, %cst_31 [1] : vector<8x16xf32> to vector<8xf32>
    %52 = vector.shape_cast %51 : vector<8xf32> to vector<8x1xf32>
    %53 = arith.addf %28, %52 : vector<8x1xf32>
    %c2 = arith.constant 2 : index
    %c0_32 = arith.constant 0 : index
    %c0_33 = arith.constant 0 : index
    %54 = vector.load %arg2[%c2, %c0_32, %c0_33] : memref<4x16x64xf32, #tpu.memory_space<vmem>>, vector<1x16x64xf32>
    %55 = vector.shape_cast %54 : vector<1x16x64xf32> to vector<16x64xf32>
    %cst_34 = arith.constant dense<0.000000e+00> : vector<8x64xf32>
    %56 = tpu.matmul %50, %55, %cst_34 {dimension_numbers = #tpu.dot_dimension_numbers<[1], [0], [0], [1], [0, 0, 1, 1], [], []>} : vector<8x16xf32>, vector<16x64xf32>, vector<8x64xf32> -> vector<8x64xf32>
    %c2_35 = arith.constant 2 : index
    %c0_36 = arith.constant 0 : index
    %c0_37 = arith.constant 0 : index
    %57 = vector.load %arg3[%c2_35, %c0_36, %c0_37] : memref<4x1x64xf32, #tpu.memory_space<vmem>>, vector<1x1x64xf32>
    %58 = vector.shape_cast %57 : vector<1x1x64xf32> to vector<1x64xf32>
    %59 = vector.broadcast %58 : vector<1x64xf32> to vector<8x64xf32>
    %60 = arith.addf %56, %59 : vector<8x64xf32>
    %cst_38 = arith.constant 0.000000e+00 : f32
    %61 = vector.broadcast %cst_38 : f32 to vector<8x64xf32>
    %62 = arith.maximumf %60, %61 : vector<8x64xf32>
    %c2_39 = arith.constant 2 : index
    %c0_40 = arith.constant 0 : index
    %c0_41 = arith.constant 0 : index
    %63 = vector.load %arg4[%c2_39, %c0_40, %c0_41] : memref<4x64x32xf32, #tpu.memory_space<vmem>>, vector<1x64x32xf32>
    %64 = vector.shape_cast %63 : vector<1x64x32xf32> to vector<64x32xf32>
    %cst_42 = arith.constant dense<0.000000e+00> : vector<8x32xf32>
    %65 = tpu.matmul %62, %64, %cst_42 {dimension_numbers = #tpu.dot_dimension_numbers<[1], [0], [0], [1], [0, 0, 1, 1], [], []>} : vector<8x64xf32>, vector<64x32xf32>, vector<8x32xf32> -> vector<8x32xf32>
    %c2_43 = arith.constant 2 : index
    %c0_44 = arith.constant 0 : index
    %c0_45 = arith.constant 0 : index
    %66 = vector.load %arg5[%c2_43, %c0_44, %c0_45] : memref<4x1x32xf32, #tpu.memory_space<vmem>>, vector<1x1x32xf32>
    %67 = vector.shape_cast %66 : vector<1x1x32xf32> to vector<1x32xf32>
    %68 = vector.broadcast %67 : vector<1x32xf32> to vector<8x32xf32>
    %69 = arith.addf %65, %68 : vector<8x32xf32>
    %70 = vector.extract_strided_slice %69 {offsets = [0, 0], sizes = [8, 16], strides = [1, 1]} : vector<8x32xf32> to vector<8x16xf32>
    %71 = math.tanh %70 : vector<8x16xf32>
    %72 = vector.extract_strided_slice %69 {offsets = [0, 16], sizes = [8, 16], strides = [1, 1]} : vector<8x32xf32> to vector<8x16xf32>
    %73 = math.exp %71 : vector<8x16xf32>
    %74 = arith.mulf %25, %73 : vector<8x16xf32>
    %75 = arith.addf %74, %72 : vector<8x16xf32>
    %cst_46 = arith.constant dense<0.000000e+00> : vector<8xf32>
    %76 = vector.multi_reduction <add>, %71, %cst_46 [1] : vector<8x16xf32> to vector<8xf32>
    %77 = vector.shape_cast %76 : vector<8xf32> to vector<8x1xf32>
    %78 = arith.addf %53, %77 : vector<8x1xf32>
    %c3 = arith.constant 3 : index
    %c0_47 = arith.constant 0 : index
    %c0_48 = arith.constant 0 : index
    %79 = vector.load %arg2[%c3, %c0_47, %c0_48] : memref<4x16x64xf32, #tpu.memory_space<vmem>>, vector<1x16x64xf32>
    %80 = vector.shape_cast %79 : vector<1x16x64xf32> to vector<16x64xf32>
    %cst_49 = arith.constant dense<0.000000e+00> : vector<8x64xf32>
    %81 = tpu.matmul %75, %80, %cst_49 {dimension_numbers = #tpu.dot_dimension_numbers<[1], [0], [0], [1], [0, 0, 1, 1], [], []>} : vector<8x16xf32>, vector<16x64xf32>, vector<8x64xf32> -> vector<8x64xf32>
    %c3_50 = arith.constant 3 : index
    %c0_51 = arith.constant 0 : index
    %c0_52 = arith.constant 0 : index
    %82 = vector.load %arg3[%c3_50, %c0_51, %c0_52] : memref<4x1x64xf32, #tpu.memory_space<vmem>>, vector<1x1x64xf32>
    %83 = vector.shape_cast %82 : vector<1x1x64xf32> to vector<1x64xf32>
    %84 = vector.broadcast %83 : vector<1x64xf32> to vector<8x64xf32>
    %85 = arith.addf %81, %84 : vector<8x64xf32>
    %cst_53 = arith.constant 0.000000e+00 : f32
    %86 = vector.broadcast %cst_53 : f32 to vector<8x64xf32>
    %87 = arith.maximumf %85, %86 : vector<8x64xf32>
    %c3_54 = arith.constant 3 : index
    %c0_55 = arith.constant 0 : index
    %c0_56 = arith.constant 0 : index
    %88 = vector.load %arg4[%c3_54, %c0_55, %c0_56] : memref<4x64x32xf32, #tpu.memory_space<vmem>>, vector<1x64x32xf32>
    %89 = vector.shape_cast %88 : vector<1x64x32xf32> to vector<64x32xf32>
    %cst_57 = arith.constant dense<0.000000e+00> : vector<8x32xf32>
    %90 = tpu.matmul %87, %89, %cst_57 {dimension_numbers = #tpu.dot_dimension_numbers<[1], [0], [0], [1], [0, 0, 1, 1], [], []>} : vector<8x64xf32>, vector<64x32xf32>, vector<8x32xf32> -> vector<8x32xf32>
    %c3_58 = arith.constant 3 : index
    %c0_59 = arith.constant 0 : index
    %c0_60 = arith.constant 0 : index
    %91 = vector.load %arg5[%c3_58, %c0_59, %c0_60] : memref<4x1x32xf32, #tpu.memory_space<vmem>>, vector<1x1x32xf32>
    %92 = vector.shape_cast %91 : vector<1x1x32xf32> to vector<1x32xf32>
    %93 = vector.broadcast %92 : vector<1x32xf32> to vector<8x32xf32>
    %94 = arith.addf %90, %93 : vector<8x32xf32>
    %95 = vector.extract_strided_slice %94 {offsets = [0, 0], sizes = [8, 16], strides = [1, 1]} : vector<8x32xf32> to vector<8x16xf32>
    %96 = math.tanh %95 : vector<8x16xf32>
    %97 = vector.extract_strided_slice %94 {offsets = [0, 16], sizes = [8, 16], strides = [1, 1]} : vector<8x32xf32> to vector<8x16xf32>
    %98 = math.exp %96 : vector<8x16xf32>
    %99 = arith.mulf %50, %98 : vector<8x16xf32>
    %100 = arith.addf %99, %97 : vector<8x16xf32>
    %cst_61 = arith.constant dense<0.000000e+00> : vector<8xf32>
    %101 = vector.multi_reduction <add>, %96, %cst_61 [1] : vector<8x16xf32> to vector<8xf32>
    %102 = vector.shape_cast %101 : vector<8xf32> to vector<8x1xf32>
    %103 = arith.addf %78, %102 : vector<8x1xf32>
    %104 = tpu.concatenate %100, %75 in 1 : vector<8x16xf32>, vector<8x16xf32> -> vector<8x32xf32>
    %c0_62 = arith.constant 0 : index
    %c0_63 = arith.constant 0 : index
    %105 = vector.load %arg6[%c0_62, %c0_63] : memref<8x32xf32, #tpu.memory_space<vmem>>, vector<8x32xf32>
    tpu.vector_store %arg6[%c0_62, %c0_63], %104 {strides = array<i32>} : memref<8x32xf32, #tpu.memory_space<vmem>>, vector<8x32xf32>,
    %c0_64 = arith.constant 0 : index
    %c0_65 = arith.constant 0 : index
    %106 = vector.load %arg7[%c0_64, %c0_65] : memref<8x1xf32, #tpu.memory_space<vmem>>, vector<8x1xf32>
    tpu.vector_store %arg7[%c0_64, %c0_65], %103 {strides = array<i32>} : memref<8x1xf32, #tpu.memory_space<vmem>>, vector<8x1xf32>,
    return
  }
  func.func @transform_0(%arg0: i32) -> (i32, i32) {
    %c0_i32 = arith.constant 0 : i32
    %c0_i32_0 = arith.constant 0 : i32
    return %arg0, %c0_i32 : i32, i32
  }
  func.func @transform_1(%arg0: i32) -> (i32, i32, i32) {
    %c0_i32 = arith.constant 0 : i32
    %c0_i32_0 = arith.constant 0 : i32
    %c0_i32_1 = arith.constant 0 : i32
    %c0_i32_2 = arith.constant 0 : i32
    return %c0_i32, %c0_i32_0, %c0_i32_1 : i32, i32, i32
  }
  func.func @transform_2(%arg0: i32) -> (i32, i32, i32) {
    %c0_i32 = arith.constant 0 : i32
    %c0_i32_0 = arith.constant 0 : i32
    %c0_i32_1 = arith.constant 0 : i32
    %c0_i32_2 = arith.constant 0 : i32
    return %c0_i32, %c0_i32_0, %c0_i32_1 : i32, i32, i32
  }
  func.func @transform_3(%arg0: i32) -> (i32, i32, i32) {
    %c0_i32 = arith.constant 0 : i32
    %c0_i32_0 = arith.constant 0 : i32
    %c0_i32_1 = arith.constant 0 : i32
    %c0_i32_2 = arith.constant 0 : i32
    return %c0_i32, %c0_i32_0, %c0_i32_1 : i32, i32, i32
  }
  func.func @transform_4(%arg0: i32) -> (i32, i32, i32) {
    %c0_i32 = arith.constant 0 : i32
    %c0_i32_0 = arith.constant 0 : i32
    %c0_i32_1 = arith.constant 0 : i32
    %c0_i32_2 = arith.constant 0 : i32
    return %c0_i32, %c0_i32_0, %c0_i32_1 : i32, i32, i32
  }
  func.func @transform_5(%arg0: i32) -> (i32, i32) {
    %c0_i32 = arith.constant 0 : i32
    %c0_i32_0 = arith.constant 0 : i32
    return %arg0, %c0_i32 : i32, i32
  }
  func.func @transform_6(%arg0: i32) -> (i32, i32) {
    %c0_i32 = arith.constant 0 : i32
    %c0_i32_0 = arith.constant 0 : i32
    return %arg0, %c0_i32 : i32, i32
  }
}

</mosaic_0001>

<bundles_post_ra>
// kernel: tpu_custom_call.1
= control target key start
LH: loop header
LB: loop body
LE: loop exit
PB: predicated region body
PF: predicated region fallthrough
CT: control target
= control target key end

     0   :  { %v1111_v2 = vmov 0.0|0.0   ;;  %vm1112_vm0 = vmmov 0   ;;  %v1113_v4 = vmov 0.0   ;;  %vm33_vm1 = vcmask 130048   ;;  %s1386_s0 = inlined_call_operand.vmem [shape: f32[8,32], index: 0, kind: input, shape index: {}]   ;;  %s1387_s1 = inlined_call_operand.vmem [shape: f32[4,16,64], index: 1, kind: input, shape index: {}]   ;;  %s1388_s2 = inlined_call_operand.vmem [shape: f32[4,1,64], index: 2, kind: input, shape index: {}]   ;;  %s1389_s3 = inlined_call_operand.vmem [shape: f32[4,64,32], index: 3, kind: input, shape index: {}]   ;;  %s1390_s4 = inlined_call_operand.vmem [shape: f32[4,1,32], index: 4, kind: input, shape index: {}]   ;;  %s1391_s5 = inlined_call_operand.hbm [shape: f32[8,32], index: 5, kind: output, shape index: {0}]   ;;  %s1392_s6 = inlined_call_operand.vmem [shape: f32[8,1], index: 6, kind: output, shape index: {1}]  }
   0x1   :  { %v24_v0 = vld [vmem:[%s1387_s1] sm:$0xff]  ;;  %v25_v1 = vld [vmem:[%s1387_s1 + $0x8] sm:$0xff]  ;;  %1005 = vmatprep.subr.bf16.mxu1 %v1111_v2  ;;  %905 = vmatprep.mubr.msk.f32.mxu1 %vm1112_vm0, %v1113_v4 }
   0x2   :  { %v1006_v3 = vpack.c.bf16 %v25_v1, %v24_v0  ;;  %v108_v5 = vld [vmem:[%s1389_s3] sm:$0xff]  ;;  %v109_v6 = vld [vmem:[%s1389_s3 + $0x8] sm:$0xff]  ;;  %1020 = vmatprep.subr.bf16.mxu0 %v1111_v2  ;;  %931 = vmatprep.mubr.msk.f32.mxu0 %vm1112_vm0, %v1113_v4 }
   0x3   :  { %v1173_v7 = vld [vmem:[%s1386_s0] sm:$0xff]  ;;  %v1009_v8 = vpack.c.bf16 %v109_v6, %v108_v5 }
   0x4   :  { %1007 = vmatpush3.bf16.msra.mxu1 %v1006_v3 }
   0x5   :  { %12 = vsyncpa [#allocation3], 0  ;;  %1008 = vmatprep.subr.bf16.mxu1 %v1111_v2  ;;  %v110_v9 = vld [vmem:[%s1389_s3 + $0x10] sm:$0xff]  ;;  %v111_v10 = vld [vmem:[%s1389_s3 + $0x18] sm:$0xff]  ;;  %vm123_vm2 = vcmask 523264   ;;  %s1114_s26 = smov 16  }
   0x6   :  { %v1012_v11 = vpack.c.bf16 %v111_v10, %v110_v9  ;;  %v112_v12 = vld [vmem:[%s1389_s3 + $0x20] sm:$0xff]  ;;  %v113_v13 = vld [vmem:[%s1389_s3 + $0x28] sm:$0xff]  ;;  %v114_v15 = vld [vmem:[%s1389_s3 + $0x30] sm:$0xff]  ;;  %s1115_s27 = smov 112   ;;  %vm779_vm3 = vcmask 261120  }
   0x7   :  { %906 = vmatmul.mubr.msk.f32.vlgmr.msra.gmra.mrb[0].mxu1 %vm33_vm1, %v1173_v7  ;;  %v1015_v14 = vpack.c.bf16 %v113_v13, %v112_v12  ;;  %v115_v16 = vld [vmem:[%s1389_s3 + $0x38] sm:$0xff]  ;;  %v801_v18 = vld [vmem:[%s1388_s2] ss:$0 sm:$0xff]  ;;  %v805_v29 = vld [vmem:[%s1387_s1 + $0x10] sm:$0xff] }
   0x8   :  { %1010 = vmatpush3.bf16.msra.mxu1 %v1009_v8  ;;  %924 = vmatprep.mubr.msk.f32.mxu1 %vm1112_vm0, %v1113_v4  ;;  %v1018_v17 = vpack.c.bf16 %v115_v16, %v114_v15  ;;  %v803_v23 = vld [vmem:[%s1390_s4] ss:$0 sm:$0xff]  ;;  %v806_v30 = vld [vmem:[%s1387_s1 + $0x18] sm:$0xff]  ;;  %v811_v37 = vld [vmem:[%s1389_s3 + $0x48] sm:$0xff] }
   0x9   :  { %1011 = vmatprep.subr.bf16.mxu1 %v1111_v2  ;;  %v1021_v31 = vpack.c.bf16 %v806_v30, %v805_v29  ;;  %v810_v36 = vld [vmem:[%s1389_s3 + $0x40] sm:$0xff]  ;;  %v812_v39 = vld [vmem:[%s1389_s3 + $0x50] sm:$0xff]  ;;  %v813_v40 = vld [vmem:[%s1389_s3 + $0x58] sm:$0xff] }
   0xa   :  { %v1024_v38 = vpack.c.bf16 %v811_v37, %v810_v36  ;;  %v1027_v42 = vpack.c.bf16 %v813_v40, %v812_v39  ;;  %v814_v43 = vld [vmem:[%s1389_s3 + $0x60] sm:$0xff]  ;;  %v815_v44 = vld [vmem:[%s1389_s3 + $0x68] sm:$0xff]  ;;  %v816_v46 = vld [vmem:[%s1389_s3 + $0x70] sm:$0xff] }
   0xb   :  { %1022 = vmatpush3.bf16.msra.mxu0 %v1021_v31  ;;  %v1030_v45 = vpack.c.bf16 %v815_v44, %v814_v43  ;;  %v817_v47 = vld [vmem:[%s1389_s3 + $0x78] sm:$0xff]  ;;  %v808_v49 = vld [vmem:[%s1388_s2 + $0x1] ss:$0 sm:$0xff]  ;;  %v822_v55 = vld [vmem:[%s1387_s1 + $0x28] sm:$0xff] }
   0xc   :  { %1013 = vmatpush3.bf16.msra.mxu1 %v1012_v11  ;;  %1023 = vmatprep.subr.bf16.mxu0 %v1111_v2  ;;  %v1033_v48 = vpack.c.bf16 %v817_v47, %v816_v46  ;;  %v821_v54 = vld [vmem:[%s1387_s1 + $0x20] sm:$0xff]  ;;  %v827_v1 = vld [vmem:[%s1389_s3 + $0x88] sm:$0xff]  ;;  %v828_v9 = vld [vmem:[%s1389_s3 + $0x90] sm:$0xff] }
   0xd   :  { %1014 = vmatprep.subr.bf16.mxu1 %v1111_v2  ;;  %v1036_v56 = vpack.c.bf16 %v822_v55, %v821_v54  ;;  %v819_v57 = vld [vmem:[%s1390_s4 + $0x1] ss:$0 sm:$0xff]  ;;  %v829_v10 = vld [vmem:[%s1389_s3 + $0x98] sm:$0xff]  ;;  %v831_v12 = vld [vmem:[%s1389_s3 + $0xa8] sm:$0xff] }
   0xe   :  { %v826_v0 = vld [vmem:[%s1389_s3 + $0x80] sm:$0xff]  ;;  %v1042_v11 = vpack.c.bf16 %v829_v10, %v828_v9  ;;  %v833_v15 = vld [vmem:[%s1389_s3 + $0xb8] sm:$0xff]  ;;  %v837_v31 = vld [vmem:[%s1387_s1 + $0x30] sm:$0xff] }
   0xf   :  { %v1039_v6 = vpack.c.bf16 %v827_v1, %v826_v0  ;;  %v842_v39 = vld [vmem:[%s1389_s3 + $0xc0] sm:$0xff]  ;;  %v843_v40 = vld [vmem:[%s1389_s3 + $0xc8] sm:$0xff] }
  0x10   :  { %1016 = vmatpush3.bf16.msra.mxu1 %v1015_v14  ;;  %v832_v14 = vld [vmem:[%s1389_s3 + $0xb0] sm:$0xff]  ;;  %v847_v46 = vld [vmem:[%s1389_s3 + $0xe8] sm:$0xff] }
  0x11   :  { %1017 = vmatprep.subr.bf16.mxu1 %v1111_v2  ;;  %v1048_v16 = vpack.c.bf16 %v833_v15, %v832_v14 }
  0x14   :  { %1019 = vmatpush3.bf16.msra.mxu1 %v1018_v17  ;;  %v824_v17 = vld [vmem:[%s1388_s2 + $0x2] ss:$0 sm:$0xff] }
  0x15   :  { %1035 = vmatprep.subr.bf16.mxu1 %v1111_v2 }
  0xda   :  { %v103_v19 = vpop.f32.mrb[0].mxu1 }
  0xdb   :  { %v104_v20 = vadd.f32 %v801_v18, %v103_v19  ;;  %v907_v21 = vpop.f32.mrb[1].mxu1 }
  0xdd   :  { %v107_v22 = vmax.f32 %v104_v20, 0.0 }
  0xdf   :  { %925 = vmatmul.mubr.msk.f32.vlgmr.msra.gmra.mrb[2].mxu1 %vm123_vm2, %v107_v22  ;;  %v835_v22 = vld [vmem:[%s1390_s4 + $0x2] ss:$0 sm:$0xff] }
  0xe0   :  { %957 = vmatprep.mubr.msk.f32.mxu1 %vm1112_vm0, %v1113_v4  ;;  %1037 = vmatpush3.bf16.msra.mxu1 %v1036_v56 }
  0xe1   :  { %1038 = vmatprep.subr.bf16.mxu1 %v1111_v2 }
 0x1b2   :  { %v193_v24 = vpop.f32.mrb[2].mxu1 }
 0x1b3   :  { %v194_v25 = vadd.f32 %v803_v23, %v193_v24  ;;  %v926_v26 = vpop.f32.mrb[3].mxu1 }
 0x1b5   :  { %1071 = vtanh.f32 %v194_v25 }
 0x1bf   :  { %v1211_v27 = vpop.eup %1071 }
 0x1c0   :  { %v198_v28 = vmul.f32 1.442695, %v1211_v27  ;;  %v206_v30 = vsel %vm33_vm1, %v1211_v27, 0.0 }
 0x1c2   :  { %1073 = vpow2.f32 %v198_v28 }
 0x1cc   :  { %v1074_v32 = vpop.eup %1073 }
 0x1cd   :  { %201 = vrot.lane.b32.xlu0 %v1074_v32, %s1114_s26  ;;  %v838_v32 = vld [vmem:[%s1387_s1 + $0x38] sm:$0xff] }
 0x23f   :  { %v202_v33 = vpop.permute.xlu0 %201 }
 0x240   :  { %v204_v34 = vmul.f32 %v202_v33, %v1173_v7  ;;  %v1051_v33 = vpack.c.bf16 %v838_v32, %v837_v31 }
 0x242   :  { %v1223_v35 = vadd.f32 %v204_v34, %v194_v25 }
 0x244   :  { %222 = vrot.lane.b32.xlu0 %v1223_v35, %s1115_s27 }
 0x2b6   :  { %v223_v41 = vpop.permute.xlu0 %222 }
 0x2b7   :  { %932 = vmatmul.mubr.msk.f32.vlgmr.msra.gmra.mrb[0].mxu0 %vm33_vm1, %v223_v41  ;;  %v1054_v41 = vpack.c.bf16 %v843_v40, %v842_v39 }
 0x2b8   :  { %1025 = vmatpush3.bf16.msra.mxu0 %v1024_v38  ;;  %950 = vmatprep.mubr.msk.f32.mxu0 %vm1112_vm0, %v1113_v4 }
 0x2b9   :  { %1026 = vmatprep.subr.bf16.mxu0 %v1111_v2 }
 0x2bc   :  { %1028 = vmatpush3.bf16.msra.mxu0 %v1027_v42  ;;  %v845_v42 = vld [vmem:[%s1389_s3 + $0xd8] sm:$0xff] }
 0x2bd   :  { %1029 = vmatprep.subr.bf16.mxu0 %v1111_v2 }
 0x2c0   :  { %1031 = vmatpush3.bf16.msra.mxu0 %v1030_v45  ;;  %v846_v45 = vld [vmem:[%s1389_s3 + $0xe0] sm:$0xff] }
 0x2c1   :  { %1032 = vmatprep.subr.bf16.mxu0 %v1111_v2  ;;  %v1060_v47 = vpack.c.bf16 %v847_v46, %v846_v45 }
 0x2c4   :  { %1034 = vmatpush3.bf16.msra.mxu0 %v1033_v48  ;;  %v849_v48 = vld [vmem:[%s1389_s3 + $0xf8] sm:$0xff] }
 0x2c5   :  { %1050 = vmatprep.subr.bf16.mxu0 %v1111_v2 }
 0x38a   :  { %v292_v50 = vpop.f32.mrb[0].mxu0 }
 0x38b   :  { %v293_v51 = vadd.f32 %v808_v49, %v292_v50  ;;  %v933_v52 = vpop.f32.mrb[1].mxu0  ;;  %v840_v50 = vld [vmem:[%s1388_s2 + $0x3] ss:$0 sm:$0xff]  ;;  %s1116_s2 = smov [#allocation2]  }
 0x38d   :  { %v296_v53 = vmax.f32 %v293_v51, 0.0 }
 0x38f   :  { %951 = vmatmul.mubr.msk.f32.vlgmr.msra.gmra.mrb[2].mxu0 %vm123_vm2, %v296_v53 }
 0x390   :  { %983 = vmatprep.mubr.msk.f32.mxu0 %vm1112_vm0, %v1113_v4  ;;  %1052 = vmatpush3.bf16.msra.mxu0 %v1051_v33 }
 0x391   :  { %1053 = vmatprep.subr.bf16.mxu0 %v1111_v2 }
 0x462   :  { %v383_v58 = vpop.f32.mrb[2].mxu0 }
 0x463   :  { %v384_v59 = vadd.f32 %v819_v57, %v383_v58  ;;  %v952_v60 = vpop.f32.mrb[3].mxu0 }
 0x465   :  { %392 = vrot.lane.b32.xlu1 %v384_v59, %s1115_s27  ;;  %1075 = vtanh.f32 %v384_v59 }
 0x46f   :  { %v1076_v61 = vpop.eup %1075 }
 0x470   :  { %v388_v62 = vmul.f32 1.442695, %v1076_v61  ;;  %v396_v27 = vsel %vm33_vm1, %v1076_v61, 0.0 }
 0x472   :  { %1077 = vpow2.f32 %v388_v62 }
 0x47c   :  { %v1078_v63 = vpop.eup %1077 }
 0x47d   :  { %v390_v3 = vmul.f32 %v1078_v63, %v1173_v7  ;;  %v830_v7 = vld [vmem:[%s1389_s3 + $0xa0] sm:$0xff] }
 0x47e   :  { %v1045_v13 = vpack.c.bf16 %v831_v12, %v830_v7 }
 0x4d7   :  { %v393_v5 = vpop.permute.xlu1 %392 }
 0x4d8   :  { %v1282_v8 = vadd.f32 %v393_v5, %v390_v3 }
 0x4da   :  { %958 = vmatmul.mubr.msk.f32.vlgmr.msra.gmra.mrb[4].mxu1 %vm33_vm1, %v1282_v8 }
 0x4db   :  { %1040 = vmatpush3.bf16.msra.mxu1 %v1039_v6  ;;  %976 = vmatprep.mubr.msk.f32.mxu1 %vm1112_vm0, %v1113_v4 }
 0x4dc   :  { %1041 = vmatprep.subr.bf16.mxu1 %v1111_v2 }
 0x4df   :  { %1043 = vmatpush3.bf16.msra.mxu1 %v1042_v11 }
 0x4e0   :  { %1044 = vmatprep.subr.bf16.mxu1 %v1111_v2 }
 0x4e3   :  { %1046 = vmatpush3.bf16.msra.mxu1 %v1045_v13 }
 0x4e4   :  { %1047 = vmatprep.subr.bf16.mxu1 %v1111_v2 }
 0x4e7   :  { %1049 = vmatpush3.bf16.msra.mxu1 %v1048_v16 }
 0x5ad   :  { %v480_v18 = vpop.f32.mrb[4].mxu1 }
 0x5ae   :  { %v481_v19 = vadd.f32 %v824_v17, %v480_v18  ;;  %v959_v20 = vpop.f32.mrb[5].mxu1 }
 0x5b0   :  { %v484_v21 = vmax.f32 %v481_v19, 0.0 }
 0x5b2   :  { %977 = vmatmul.mubr.msk.f32.vlgmr.msra.gmra.mrb[6].mxu1 %vm123_vm2, %v484_v21 }
 0x685   :  { %v571_v23 = vpop.f32.mrb[6].mxu1 }
 0x686   :  { %v572_v24 = vadd.f32 %v835_v22, %v571_v23  ;;  %v978_v25 = vpop.f32.mrb[7].mxu1 }
 0x688   :  { %1079 = vtanh.f32 %v572_v24 }
 0x692   :  { %v1080_v26 = vpop.eup %1079 }
 0x693   :  { %v576_v28 = vmul.f32 1.442695, %v1080_v26  ;;  %v584_v38 = vsel %vm33_vm1, %v1080_v26, 0.0 }
 0x695   :  { %1081 = vpow2.f32 %v576_v28 }
 0x69f   :  { %v1082_v29 = vpop.eup %1081 }
 0x6a0   :  { %579 = vrot.lane.b32.xlu1 %v1082_v29, %s1114_s26 }
 0x6c4   :  { %207 = vadd.xlane.f32.xlu1 %v206_v30 }
 0x712   :  { %v580_v34 = vpop.permute.xlu1 %579 }
 0x713   :  { %v582_v36 = vmul.f32 %v580_v34, %v1223_v35  ;;  %v844_v35 = vld [vmem:[%s1389_s3 + $0xd0] sm:$0xff] }
 0x714   :  { %v1057_v44 = vpack.c.bf16 %v845_v42, %v844_v35 }
 0x715   :  { %v583_v37 = vadd.f32 %v582_v36, %v572_v24 }
 0x717   :  { %600 = vrot.lane.b32.xlu0 %v583_v37, %s1115_s27 }
 0x736   :  { %397 = vadd.xlane.f32.xlu0 %v396_v27 }
 0x73a   :  { %585 = vadd.xlane.f32.xlu0 %v584_v38 }
 0x789   :  { %v601_v43 = vpop.permute.xlu0 %600 }
 0x78a   :  { %984 = vmatmul.mubr.msk.f32.vlgmr.msra.gmra.mrb[4].mxu0 %vm33_vm1, %v601_v43 }
 0x78b   :  { %1055 = vmatpush3.bf16.msra.mxu0 %v1054_v41  ;;  %1002 = vmatprep.mubr.msk.f32.mxu0 %vm1112_vm0, %v1113_v4  ;;  %v848_v4 = vld [vmem:[%s1389_s3 + $0xf0] sm:$0xff]  ;;  %s789_s3 = sshll.u32 %s1116_s2, 4  ;;  %s790_s3 = int_to_ptr.vmem [resolvable:$true] %s789_s3 }
 0x78c   :  { %1056 = vmatprep.subr.bf16.mxu0 %v1111_v2  ;;  %v1063_v49 = vpack.c.bf16 %v849_v48, %v848_v4  ;;  %p1092_p1 = scmp.lt.s32.totalorder %s790_s3, %s790_s3 }
 0x78f   :  { %1058 = vmatpush3.bf16.msra.mxu0 %v1057_v44 }
 0x790   :  { %1059 = vmatprep.subr.bf16.mxu0 %v1111_v2 }
 0x793   :  { %1061 = vmatpush3.bf16.msra.mxu0 %v1060_v47 }
 0x794   :  { %1062 = vmatprep.subr.bf16.mxu0 %v1111_v2  ;;  %v851_v2 = vld [vmem:[%s1390_s4 + $0x3] ss:$0 sm:$0xff]  ;;  %s1087_s4 = scalar_lea.vmem %s790_s3, 128 }
 0x795   :  { %p1088_p0 = scmp.ne.s32.totalorder %s790_s3, %s1087_s4  ;;  %p1093_p2 = scmp.lt.s32.totalorder %s1087_s4, %s1087_s4 }
 0x797   :  { %1064 = vmatpush3.bf16.msra.mxu0 %v1063_v49  ;;  %p1094_p3 = por %p1093_p2, %p1092_p1 }
 0x799   :  { %p1095_p4 = pnand %p1094_p3, %p1088_p0 }
 0x7c3   :  { %v398_v61 = vpop.xlane.xlu0 %397 }
 0x7c7   :  { %v586_v63 = vpop.xlane.xlu0 %585 }
 0x85d   :  { %v670_v51 = vpop.f32.mrb[4].mxu0 }
 0x85e   :  { %v671_v52 = vadd.f32 %v840_v50, %v670_v51  ;;  %v985_v53 = vpop.f32.mrb[5].mxu0 }
 0x860   :  { %v674_v54 = vmax.f32 %v671_v52, 0.0 }
 0x862   :  { %1003 = vmatmul.mubr.msk.f32.vlgmr.msra.gmra.mrb[6].mxu0 %vm123_vm2, %v674_v54 }
 0x935   :  { %v761_v55 = vpop.f32.mrb[6].mxu0 }
 0x936   :  { %v762_v56 = vadd.f32 %v851_v2, %v761_v55  ;;  %v1004_v57 = vpop.f32.mrb[7].mxu0 }
 0x938   :  { %1083 = vtanh.f32 %v762_v56  ;;  %770 = vrot.lane.b32.xlu0 %v762_v56, %s1115_s27 }
 0x942   :  { %v1084_v58 = vpop.eup %1083 }
 0x943   :  { %v774_v59 = vsel %vm33_vm1, %v1084_v58, 0.0  ;;  %v766_v60 = vmul.f32 1.442695, %v1084_v58 }
 0x944   :  { %775 = vadd.xlane.f32.xlu1 %v774_v59 }
 0x945   :  { %1085 = vpow2.f32 %v766_v60 }
 0x94f   :  { %v1086_v62 = vpop.eup %1085 }
 0x950   :  { %v768_v0 = vmul.f32 %v1086_v62, %v1282_v8 }
 0x9aa   :  { %v771_v1 = vpop.permute.xlu0 %770 }
 0x9ab   :  { %v773_v3 = vadd.f32 %v771_v1, %v768_v0 }
 0x9ad   :  { %v778_v5 = vsel %vm33_vm1, %v773_v3, %v583_v37 }
 0x9ae   :  { %780 = vst.msk [vmem:[#allocation2] sm:$0xff] %vm779_vm3, %v778_v5 }
 0x9af   :  { %1098 = shalt.err (!%p1095_p4)
}
 0x9b0   :  { %s1099_s24 = scalar_lea.hbm %s1391_s5, 128 }
 0x9b1   :  { %p1100_p5 = scmp.ne.s32.totalorder %s1391_s5, %s1099_s24  ;;  %p1103_p6 = scmp.lt.u32.totalorder %s1099_s24, %s1391_s5 }
 0x9b3   :  { %p1105_p7 = pnand %p1103_p6, %p1100_p5 }
 0x9b5   :  { %1108 = shalt.err (!%p1105_p7)
}
 0x9b6   :  { %792 = dma.vmem_to_hbm [thread:$0]  %s790_s3, 128, %s1391_s5, [#allocation3]   ;;  %v208_v6 = vpop.xlane.xlu1 %207  ;;  %vm781_vm4 = vcmask 7168  }
 0x9b7   :  { %v399_v8 = vadd.f32 %v398_v61, %v208_v6 }
 0x9b9   :  { %v587_v9 = vadd.f32 %v586_v63, %v399_v8 }
 0x9d1   :  { %v776_v10 = vpop.xlane.xlu1 %775 }
 0x9d2   :  { %v777_v11 = vadd.f32 %v776_v10, %v587_v9 }
 0x9d4   :  { %782 = vst.msk [vmem:[%s1392_s6] sm:$0xff] %vm781_vm4, %v777_v11 }
 0x9d5   :  { %1109 = dma.done.wait [#allocation3], 128  }
 0x9d6   :  { %1110 = vsyncadd [#allocation3], 4294967168 }
 0x9d7   :  { %800 = vsyncpa [#allocation3], 1 }

</bundles_post_ra>
